<compile_context>
chip_gen: v7x
topology: tpu7x:2x2x1
jax: 0.10.0
libtpu: 0.0.40
codegen_flags: <defaults>
</compile_context>

<pallas_src>
import jax
import jax.numpy as jnp
from jax.experimental import pallas as pl
from jax.experimental.pallas import tpu as pltpu


def _vmem_budget():
    """Generation-aware scoped-VMEM limit and per-step working-set budget."""
    cap = None
    try:
        cap = getattr(pltpu.get_tpu_info(), "vmem_capacity_bytes", None)
    except Exception:
        cap = None
    if not cap:
        cap = 64 * 1024 * 1024                      # assume the smallest part (v7x: 64 MiB)
    limit = min(cap * 3 // 4, 100 * 1024 * 1024)     # 48 MiB on v7x, 96-100 MiB on v5e/v6e
    budget = min(cap * 3 // 8, 48 * 1024 * 1024)     # 24 MiB on v7x, 48 MiB on v5e/v6e
    return int(limit), int(budget)


def _largest_divisor(n, limit, multiple_of=1):
    limit = max(1, min(n, limit))
    for cand in range(limit, 0, -1):
        if n % cand == 0 and cand % multiple_of == 0:
            return cand
    return None


def _pick_tile_rows(H, W, Cin, Cout, budget, n_batch):
    """Number of low-res rows per block: as large as the VMEM budget allows,
    an exact divisor of H, with a floor so the grid never degenerates."""
    # Double-buffered per-low-res-row working set: x1 row + (x2 + out) output rows (f32).
    per_row = 2 * W * (Cin + 8 * Cout) * 4
    t_budget = max(1, budget // max(per_row, 1))
    if H <= t_budget:
        tile = H
    else:
        tile = _largest_divisor(H, t_budget, 8) or _largest_divisor(H, t_budget, 1)
        # Degenerate divisor (e.g. prime H): take one big block if it still fits 2x budget.
        if tile < min(8, H) and H * per_row <= 2 * budget:
            tile = H
    # Keep >=2 program instances so both v7x TensorCores get work; on 1-TC parts this
    # only adds one extra ~0.35us grid step, so it is effectively free.
    if n_batch * (H // tile) < 2 and H % 2 == 0:
        tile = H // 2
    return tile


def _up_kernel(x1_ref, w_ref, b_ref, x2_ref, o_ref):
    # x1_ref: (1, Cin, tH, W)        NCHW block of the low-res input
    # w_ref : (4*Cout, Cin)          deconv weight, rows ordered (kj, ki, co)
    # b_ref : (4*Cout, 1)            bias replicated per (kj, ki)
    # x2_ref: (1, Cout, tH, 2, 2W)   skip connection (free (H,2) view of NCHW x2)
    # o_ref : (1, Cout, tH, 2, 2W)   aliased with x2
    cout = o_ref.shape[1]
    t_rows = o_ref.shape[2]
    wlow = x1_ref.shape[3]

    w = w_ref[...]
    b = b_ref[...]

    def body(h, carry):
        x_h = x1_ref[0, :, h, :]                                        # (Cin, W)
        # All four (ki, kj) deconv taps for this low-res row in one MXU matmul.
        r = jnp.dot(w, x_h, preferred_element_type=jnp.float32) + b     # (4*Cout, W)
        # rows [0:2Cout] -> kj=0, rows [2Cout:4Cout] -> kj=1; within each, (ki, co).
        # In-VMEM lane interleave of the two column parities -> (2*Cout, 2W).
        z = jnp.stack([r[: 2 * cout], r[2 * cout:]], axis=-1)
        z = z.reshape(2 * cout, 2 * wlow)
        out0 = z[:cout] + x2_ref[0, :, h, 0, :].astype(jnp.float32)     # ki = 0 rows
        out1 = z[cout:] + x2_ref[0, :, h, 1, :].astype(jnp.float32)     # ki = 1 rows
        o_ref[0, :, h, 0, :] = out0.astype(o_ref.dtype)
        o_ref[0, :, h, 1, :] = out1.astype(o_ref.dtype)
        return carry

    jax.lax.fori_loop(0, t_rows, body, 0)


def _fused_up_nchw(x1, x2_region, weight, bias, out_dtype):
    """ConvTranspose2d(k=2, s=2)(x1) + bias + x2_region, fused, all NCHW.

    x1:        (N, Cin, H, W)
    x2_region: (N, Cout, 2H, 2W)   (already the overlap region, dtype == out_dtype)
    returns    (N, Cout, 2H, 2W)
    """
    N, Cin, H, W = x1.shape
    Cout = weight.shape[1]

    # Free row-major view: output row parity ki becomes its own (size-2) axis.
    x2_v = x2_region.reshape(N, Cout, H, 2, 2 * W)

    # weight (Cin, Cout, ki, kj) -> rows ordered (kj, ki, co); bias replicated per tap.
    w_rows = jnp.transpose(weight, (3, 2, 1, 0)).reshape(4 * Cout, Cin).astype(jnp.float32)
    b_col = jnp.tile(bias.astype(jnp.float32), 4).reshape(4 * Cout, 1)

    vmem_limit, block_budget = _vmem_budget()
    tH = _pick_tile_rows(H, W, Cin, Cout, block_budget, N)
    grid = (N, H // tH)

    out_v = pl.pallas_call(
        _up_kernel,
        out_shape=jax.ShapeDtypeStruct((N, Cout, H, 2, 2 * W), out_dtype),
        grid_spec=pltpu.PrefetchScalarGridSpec(
            num_scalar_prefetch=0,
            grid=grid,
            in_specs=[
                pl.BlockSpec((1, Cin, tH, W), lambda n, i: (n, 0, i, 0)),
                pl.BlockSpec((4 * Cout, Cin), lambda n, i: (0, 0)),
                pl.BlockSpec((4 * Cout, 1), lambda n, i: (0, 0)),
                pl.BlockSpec((1, Cout, tH, 2, 2 * W), lambda n, i: (n, 0, i, 0, 0)),
            ],
            out_specs=pl.BlockSpec((1, Cout, tH, 2, 2 * W), lambda n, i: (n, 0, i, 0, 0)),
        ),
        compiler_params=pltpu.CompilerParams(
            dimension_semantics=("parallel", "parallel"),
            vmem_limit_bytes=vmem_limit,
        ),
        input_output_aliases={3: 0},   # reuse the x2 buffer for the output
    )(x1, w_rows, b_col, x2_v)

    return out_v.reshape(N, Cout, 2 * H, 2 * W)


@jax.jit
def up_forward(x1_nchw, x2_nchw, weight, bias):
    """Forward pass of the `up` module (all tensors NCHW, like the PyTorch module).

    x1_nchw: (N, Cin, H, W)      -- to be upsampled
    x2_nchw: (N, Cout, H2, W2)   -- skip connection, H2 >= 2H, W2 >= 2W
    weight : (Cin, Cout, 2, 2)   -- PyTorch ConvTranspose2d weight layout
    bias   : (Cout,)
    returns: (N, Cout, H2, W2)
    """
    N, Cin, H, W = x1_nchw.shape
    Cout = weight.shape[1]
    _, _, H2, W2 = x2_nchw.shape
    diffY = H2 - 2 * H
    diffX = W2 - 2 * W
    # TODO(synk): negative diff (cropping) not supported; typical U-Net has diff >= 0.
    assert diffY >= 0 and diffX >= 0
    pY, pX = diffY // 2, diffX // 2

    out_dtype = jnp.result_type(x1_nchw.dtype, x2_nchw.dtype)
    x2 = x2_nchw.astype(out_dtype)

    if diffY == 0 and diffX == 0:
        # Fast path (the CBDNet case): x2 is exactly the overlap region -> fully fused,
        # no transposes, no slicing, x2 aliased into the output.
        return _fused_up_nchw(x1_nchw, x2, weight, bias, out_dtype)

    # General (padded) path: fuse over the overlap region, pass x2 through outside.
    # TODO(synk): fold the (pY, pX) offset into the BlockSpecs to drop these two passes.
    x2_reg = jax.lax.slice(x2, (0, 0, pY, pX), (N, Cout, pY + 2 * H, pX + 2 * W))
    y = _fused_up_nchw(x1_nchw, x2_reg, weight, bias, out_dtype)
    return jax.lax.dynamic_update_slice(x2, y, (0, 0, pY, pX))


def _reference(x1_nchw, x2_nchw, weight, bias):
    """Pure-JAX reference of ConvTranspose2d(k=2, s=2) + pad + add."""
    N, Cin, H, W = x1_nchw.shape
    Cout = weight.shape[1]
    _, _, H2, W2 = x2_nchw.shape
    # y[n, co, 2i+ki, 2j+kj] = sum_ci x[n, ci, i, j] * W[ci, co, ki, kj] + b[co]
    y = jnp.einsum("ncij,codk->noidjk", x1_nchw, weight)  # (N,Cout,H,2,W,2)
    y = y.reshape(N, Cout, 2 * H, 2 * W) + bias[None, :, None, None]
    diffY, diffX = H2 - 2 * H, W2 - 2 * W
    y = jnp.pad(
        y,
        ((0, 0), (0, 0), (diffY // 2, diffY - diffY // 2), (diffX // 2, diffX - diffX // 2)),
    )
    return x2_nchw + y


if __name__ == "__main__":
    key = jax.random.PRNGKey(0)
    k1, k2, k3, k4 = jax.random.split(key, 4)

    N, in_ch, H, W = 2, 4, 16, 16
    out_ch = in_ch // 2

    x1 = jax.random.normal(k1, (N, in_ch, H, W), dtype=jnp.float32)
    x2 = jax.random.normal(k2, (N, out_ch, 2 * H, 2 * W), dtype=jnp.float32)
    # ConvTranspose2d weight layout: (in_ch, out_ch, kH, kW)
    weight = 0.1 * jax.random.normal(k3, (in_ch, out_ch, 2, 2), dtype=jnp.float32)
    bias = 0.1 * jax.random.normal(k4, (out_ch,), dtype=jnp.float32)

    out = jax.block_until_ready(up_forward(x1, x2, weight, bias))

    ref = _reference(x1, x2, weight, bias)
    assert out.shape == ref.shape == (N, out_ch, 2 * H, 2 * W)
    assert jnp.allclose(out, ref, atol=1e-5, rtol=1e-5)

    print("KERNEL_OK")
</pallas_src>

<mosaic_0001>
module attributes {stable_mosaic.version = 11 : i64} {
  func.func @_up_kernel(%arg0: i32, %arg1: i32, %arg2: memref<1x4x16x16xf32, #tpu.memory_space<vmem>>, %arg3: memref<8x4xf32, #tpu.memory_space<vmem>>, %arg4: memref<8x1xf32, #tpu.memory_space<vmem>>, %arg5: memref<1x2x16x2x32xf32, #tpu.memory_space<vmem>>, %arg6: memref<1x2x16x2x32xf32, #tpu.memory_space<vmem>>) attributes {dimension_semantics = [#tpu.dimension_semantics<parallel>, #tpu.dimension_semantics<parallel>], iteration_bounds = array<i64: 2, 1>, scalar_prefetch = 0 : i64, scratch_operands = 0 : i64, tpu.core_type = #tpu.core_type<tc>, window_params = [{transform_indices = @transform_0, window_bounds = array<i64: 1, 4, 16, 16>}, {pipeline_mode = #tpu.pipeline_mode<synchronous>, transform_indices = @transform_1, window_bounds = array<i64: 8, 4>}, {pipeline_mode = #tpu.pipeline_mode<synchronous>, transform_indices = @transform_2, window_bounds = array<i64: 8, 1>}, {transform_indices = @transform_3, window_bounds = array<i64: 1, 2, 16, 2, 32>}, {transform_indices = @transform_4, window_bounds = array<i64: 1, 2, 16, 2, 32>}]} {
    %c0 = arith.constant 0 : index
    %c0_0 = arith.constant 0 : index
    %0 = vector.load %arg3[%c0, %c0_0] : memref<8x4xf32, #tpu.memory_space<vmem>>, vector<8x4xf32>
    %c0_1 = arith.constant 0 : index
    %c0_2 = arith.constant 0 : index
    %1 = vector.load %arg4[%c0_1, %c0_2] : memref<8x1xf32, #tpu.memory_space<vmem>>, vector<8x1xf32>
    %c0_i32 = arith.constant 0 : i32
    %c16_i32 = arith.constant 16 : i32
    %2 = arith.addi %c0_i32, %c16_i32 : i32
    %c1_i32 = arith.constant 1 : i32
    scf.for %arg7 = %c0_i32 to %2 step %c1_i32  : i32 {
      %c0_4 = arith.constant 0 : index
      %c0_5 = arith.constant 0 : index
      %3 = arith.index_cast %arg7 : i32 to index
      %c0_6 = arith.constant 0 : index
      %4 = vector.load %arg2[%c0_4, %c0_5, %3, %c0_6] : memref<1x4x16x16xf32, #tpu.memory_space<vmem>>, vector<1x4x1x16xf32>
      %5 = vector.shape_cast %4 : vector<1x4x1x16xf32> to vector<4x16xf32>
      %cst = arith.constant dense<0.000000e+00> : vector<8x16xf32>
      %6 = tpu.matmul %0, %5, %cst {dimension_numbers = #tpu.dot_dimension_numbers<[1], [0], [0], [1], [0, 0, 1, 1], [], []>} : vector<8x4xf32>, vector<4x16xf32>, vector<8x16xf32> -> vector<8x16xf32>
      %7 = vector.broadcast %1 : vector<8x1xf32> to vector<8x16xf32>
      %8 = arith.addf %6, %7 : vector<8x16xf32>
      %9 = vector.extract_strided_slice %8 {offsets = [0, 0], sizes = [4, 16], strides = [1, 1]} : vector<8x16xf32> to vector<4x16xf32>
      %10 = vector.extract_strided_slice %8 {offsets = [4, 0], sizes = [4, 16], strides = [1, 1]} : vector<8x16xf32> to vector<4x16xf32>
      %11 = vector.shape_cast %9 : vector<4x16xf32> to vector<4x16x1xf32>
      %12 = vector.shape_cast %10 : vector<4x16xf32> to vector<4x16x1xf32>
      %13 = tpu.concatenate %11, %12 in 2 : vector<4x16x1xf32>, vector<4x16x1xf32> -> vector<4x16x2xf32>
      %14 = vector.shape_cast %13 : vector<4x16x2xf32> to vector<4x32xf32>
      %15 = vector.extract_strided_slice %14 {offsets = [0, 0], sizes = [2, 32], strides = [1, 1]} : vector<4x32xf32> to vector<2x32xf32>
      %c0_7 = arith.constant 0 : index
      %c0_8 = arith.constant 0 : index
      %16 = arith.index_cast %arg7 : i32 to index
      %c0_9 = arith.constant 0 : index
      %c0_10 = arith.constant 0 : index
      %17 = vector.load %arg5[%c0_7, %c0_8, %16, %c0_9, %c0_10] : memref<1x2x16x2x32xf32, #tpu.memory_space<vmem>>, vector<1x2x1x1x32xf32>
      %18 = vector.shape_cast %17 : vector<1x2x1x1x32xf32> to vector<2x32xf32>
      %19 = arith.addf %15, %18 : vector<2x32xf32>
      %20 = vector.extract_strided_slice %14 {offsets = [2, 0], sizes = [2, 32], strides = [1, 1]} : vector<4x32xf32> to vector<2x32xf32>
      %c0_11 = arith.constant 0 : index
      %c0_12 = arith.constant 0 : index
      %21 = arith.index_cast %arg7 : i32 to index
      %c1 = arith.constant 1 : index
      %c0_13 = arith.constant 0 : index
      %22 = vector.load %arg5[%c0_11, %c0_12, %21, %c1, %c0_13] : memref<1x2x16x2x32xf32, #tpu.memory_space<vmem>>, vector<1x2x1x1x32xf32>
      %23 = vector.shape_cast %22 : vector<1x2x1x1x32xf32> to vector<2x32xf32>
      %24 = arith.addf %20, %23 : vector<2x32xf32>
      %c0_14 = arith.constant 0 : index
      %c0_15 = arith.constant 0 : index
      %25 = arith.index_cast %arg7 : i32 to index
      %c0_16 = arith.constant 0 : index
      %c0_17 = arith.constant 0 : index
      %26 = vector.load %arg6[%c0_14, %c0_15, %25, %c0_16, %c0_17] : memref<1x2x16x2x32xf32, #tpu.memory_space<vmem>>, vector<1x2x1x1x32xf32>
      %27 = vector.shape_cast %26 : vector<1x2x1x1x32xf32> to vector<2x32xf32>
      %28 = vector.shape_cast %19 : vector<2x32xf32> to vector<1x2x1x1x32xf32>
      tpu.vector_store %arg6[%c0_14, %c0_15, %25, %c0_16, %c0_17], %28 {strides = array<i32>} : memref<1x2x16x2x32xf32, #tpu.memory_space<vmem>>, vector<1x2x1x1x32xf32>,
      %c0_18 = arith.constant 0 : index
      %c0_19 = arith.constant 0 : index
      %29 = arith.index_cast %arg7 : i32 to index
      %c1_20 = arith.constant 1 : index
      %c0_21 = arith.constant 0 : index
      %30 = vector.load %arg6[%c0_18, %c0_19, %29, %c1_20, %c0_21] : memref<1x2x16x2x32xf32, #tpu.memory_space<vmem>>, vector<1x2x1x1x32xf32>
      %31 = vector.shape_cast %30 : vector<1x2x1x1x32xf32> to vector<2x32xf32>
      %32 = vector.shape_cast %24 : vector<2x32xf32> to vector<1x2x1x1x32xf32>
      tpu.vector_store %arg6[%c0_18, %c0_19, %29, %c1_20, %c0_21], %32 {strides = array<i32>} : memref<1x2x16x2x32xf32, #tpu.memory_space<vmem>>, vector<1x2x1x1x32xf32>,
    }
    %c16_i32_3 = arith.constant 16 : i32
    return
  }
  func.func @transform_0(%arg0: i32, %arg1: i32) -> (i32, i32, i32, i32) {
    %c0_i32 = arith.constant 0 : i32
    %c0_i32_0 = arith.constant 0 : i32
    %c0_i32_1 = arith.constant 0 : i32
    return %arg0, %c0_i32, %arg1, %c0_i32_0 : i32, i32, i32, i32
  }
  func.func @transform_1(%arg0: i32, %arg1: i32) -> (i32, i32) {
    %c0_i32 = arith.constant 0 : i32
    %c0_i32_0 = arith.constant 0 : i32
    %c0_i32_1 = arith.constant 0 : i32
    return %c0_i32, %c0_i32_0 : i32, i32
  }
  func.func @transform_2(%arg0: i32, %arg1: i32) -> (i32, i32) {
    %c0_i32 = arith.constant 0 : i32
    %c0_i32_0 = arith.constant 0 : i32
    %c0_i32_1 = arith.constant 0 : i32
    return %c0_i32, %c0_i32_0 : i32, i32
  }
  func.func @transform_3(%arg0: i32, %arg1: i32) -> (i32, i32, i32, i32, i32) {
    %c0_i32 = arith.constant 0 : i32
    %c0_i32_0 = arith.constant 0 : i32
    %c0_i32_1 = arith.constant 0 : i32
    %c0_i32_2 = arith.constant 0 : i32
    return %arg0, %c0_i32, %arg1, %c0_i32_0, %c0_i32_1 : i32, i32, i32, i32, i32
  }
  func.func @transform_4(%arg0: i32, %arg1: i32) -> (i32, i32, i32, i32, i32) {
    %c0_i32 = arith.constant 0 : i32
    %c0_i32_0 = arith.constant 0 : i32
    %c0_i32_1 = arith.constant 0 : i32
    %c0_i32_2 = arith.constant 0 : i32
    return %arg0, %c0_i32, %arg1, %c0_i32_0, %c0_i32_1 : i32, i32, i32, i32, i32
  }
}

</mosaic_0001>

<bundles_post_ra>
// kernel: tile.8
= control target key start
LH: loop header
LB: loop body
LE: loop exit
PB: predicated region body
PF: predicated region fallthrough
CT: control target
= control target key end

     0   :  { %s22_s0 = inlined_call_operand.vmem [shape: f32[2], index: 0, kind: input, shape index: {}]   ;;  %s23_s1 = inlined_call_operand.vmem [shape: f32[4,2], index: 1, kind: output, shape index: {}]  }
   0x1   :  { %v4_v0 = vld [vmem:[%s22_s0] ss:$0 sm:$0xff] }
   0x2   :  { %5 = vst [vmem:[%s23_s1] sm:$0xf] %v4_v0 }

// kernel: tile.0
= control target key start
LH: loop header
LB: loop body
LE: loop exit
PB: predicated region body
PF: predicated region fallthrough
CT: control target
= control target key end

     0   :  { %vm7_vm0 = vcmask 7168   ;;  %s37_s0 = inlined_call_operand.vmem [shape: f32[4,2], index: 0, kind: input, shape index: {}]   ;;  %s38_s1 = inlined_call_operand.vmem [shape: f32[8,1], index: 1, kind: output, shape index: {}]  }
   0x1   :  { %v4_v0 = vld [vmem:[%s37_s0] sm:$0xf]  ;;  %s17_s0 = smov 127  }
   0x2   :  { %5 = vst [vmem:[#allocation0] sm:$0xf] %v4_v0 }
   0x9   :  { %v9_v1 = vld [vmem:[#allocation0] sm:$0xf]  }
   0xa   :  { %v6_v2 = vld [vmem:[#allocation0] sm:$0xf]   ;;  %10 = vrot.lane.b32.xlu0 %v9_v1, %s17_s0 }
   0xb   :  { %8 = vst.msk [vmem:[%s38_s1] ss:$2 sm:$0xf] %vm7_vm0, %v6_v2  }
  0x7c   :  { %v11_v3 = vpop.permute.xlu0 %10  }
  0x7d   :  { %15 = vst.msk [vmem:[%s38_s1 + $0x1] ss:$2 sm:$0xf] %vm7_vm0, %v11_v3  }

// kernel: up_forward.1
= control target key start
LH: loop header
LB: loop body
LE: loop exit
PB: predicated region body
PF: predicated region fallthrough
CT: control target
= control target key end

     0   :  { %s1053_s15 = smov 0   ;;  %s1055_s16 = smov 0   ;;  %s1186_s0 = inlined_call_operand.vmem [shape: f32[2,4,16,16], index: 0, kind: input, shape index: {}]   ;;  %s1187_s1 = inlined_call_operand.vmem [shape: f32[8,4], index: 1, kind: input, shape index: {}]   ;;  %s1188_s2 = inlined_call_operand.vmem [shape: f32[8,1], index: 2, kind: input, shape index: {}]   ;;  %s1189_s3 = inlined_call_operand.vmem [shape: f32[2,2,16,2,32], index: 3, kind: input, shape index: {}, may-alias: {3,4}]   ;;  %s1190_s4 = inlined_call_operand.vmem [shape: f32[2,2,16,2,32], index: 4, kind: output, shape index: {}, may-alias: {3,4}]  }
   0x1   :  { %s1057_s17 = smov 0  }
   0x2 LB: > { %s26_s18 = sadd.s32 1, %s997_s16  ;;  %p899_p0 = scmp.ge.s32.totalorder %s1001_s17, 1  ;;  %s1001_s17 = sphi %s1057_s17, %s14_s17   ;;  %s997_s16 = sphi %s1055_s16, %s1192_s16   ;;  %s993_s15 = sphi %s1053_s15, %s1191_s15  }
   0x3   : > { %p28_p1 = scmp.ge.s32.totalorder %s26_s18, 2  ;;  %p200_p2 = scmp.lt.s32.totalorder %s1001_s17, 3 }
   0x5   : > { %s1194_s18 = smov (%p28_p1, %s26_s18), 0  ;;  %p201_p3 = pnand %p899_p0, %p200_p2 }
   0x6   : > { %p244_p4 = scmp.lt.s32.totalorder (!%p201_p3), %s993_s15, 1  ;;  %v1074_v0 = vld [vmem:[%s1187_s1] sm:$0xff] (!%p201_p3)  ;;  %s1095_s7 = smov (!%p201_p3), 0  }
   0x7   : > { %204 = sbr.rel (%p201_p3) target bundleno = 535 (0x217), region = 36  ;;  %v1079_v1 = vld [vmem:[%s1188_s2] sm:$0xff] (!%p201_p3) }
   0xe   : > { %s1196_s15 = smov (!%p244_p4, %s993_s15), 1 }
   0xf   : > { %s1081_s23 = sshll.u32 %s1196_s15, 6 }
  0x10   : > { %s251_s26 = scalar_lea.vmem %s1186_s0, %s1081_s23  ;;  %s261_s29 = scalar_lea.vmem %s1189_s3, %s1081_s23 }
  0x11   : > { %s271_s6 = scalar_lea.vmem %s1190_s4, %s1081_s23 }
  0x12 LB: >> { %v1007_v2 = vmov 0.0   ;;  %s281_s10 = scalar_lea.vmem %s251_s26, %s1005_s7  ;;  %vm296_vm0 = vcmask 1041409   ;;  %vm1008_vm1 = vmmov 0   ;;  %v1009_v3 = vmov 0   ;;  %s1012_s11 = smov 4   ;;  %s1005_s7 = sphi %s1095_s7, %s280_s7  }
  0x13   : >> { %916 = vmatprep.subr.mxu0 %v1007_v2  ;;  %918 = vmatprep.mubr.msk.f32.mxu0 %vm1008_vm1, %v1007_v2  ;;  %v282_v4 = vld [vmem:[%s281_s10] sm:$0x1]  ;;  %v283_v5 = vld [vmem:[%s281_s10 + $0x10] sm:$0x1]  ;;  %vm299_vm2 = vcmask 1042434   ;;  %vm302_vm3 = vcmask 1043459   ;;  %v381_v14 = vlaneseq }
  0x14   : >> { %974 = vset.pattern.permute.xlu0 %v1009_v3  ;;  %v284_v6 = vld [vmem:[%s281_s10 + $0x20] sm:$0x1]  ;;  %v285_v7 = vld [vmem:[%s281_s10 + $0x30] sm:$0x1]  ;;  %v295_v8 = vrot.slane %v283_v5, 7  ;;  %vm308_vm4 = vcmask 1043456  }
  0x15   : >> { %288 = vperm.xlu0 %974, %v1079_v1   ;;  %v298_v9 = vrot.slane %v284_v6, 6  ;;  %v301_v10 = vrot.slane %v285_v7, 5  ;;  %vm304_vm5 = vcmask 31744   ;;  %v1113_v15 = vshrl.u32 %v381_v14, 7  ;;  %s1013_s12 = smov 2   ;;  %s1014_s13 = smov 8  }
  0x16   : >> { %v297_v11 = vsel %vm296_vm0, %v295_v8, %v282_v4  ;;  %v1010_v40 = vmov 1983009808   ;;  %v1011_v42 = vmov 1934713408   ;;  %vm469_vm6 = vcmask 7168   ;;  %s1015_s14 = smov 6  }
  0x17   : >> { %v300_v12 = vsel %vm299_vm2, %v298_v9, %v297_v11  ;;  %v394_v17 = vsub.s32 1, %v1113_v15  ;;  %v383_v18 = vsub.s32 0, %v1113_v15  ;;  %v405_v24 = vsub.s32 2, %v1113_v15  ;;  %s1016_s15 = smov 12   ;;  %s1017_s19 = smov 10  }
  0x18   : >> { %v303_v13 = vsel %vm302_vm3, %v301_v10, %v300_v12  ;;  %v416_v25 = vsub.s32 3, %v1113_v15  ;;  %v427_v28 = vsub.s32 4, %v1113_v15  ;;  %v438_v29 = vsub.s32 5, %v1113_v15  ;;  %s1018_s20 = smov 14   ;;  %s1019_s21 = smov 16  }
  0x19   : >> { %917 = vmatpush3.msk.msra.mxu0 %vm308_vm4, %v303_v13  ;;  %v449_v32 = vsub.s32 6, %v1113_v15  ;;  %v460_v33 = vsub.s32 7, %v1113_v15  ;;  %v481_v41 = vunpack.c.l.s4 %v1010_v40  ;;  %v513_v43 = vunpack.c.l.s4 %v1011_v42  ;;  %s1020_s22 = smov 18   ;;  %s1021_s24 = smov 20  }
  0x1a   : >> { %919 = vmatmul.mubr.msk.f32.vlgmr.msra.gmra.mrb[0].mxu0 %vm304_vm5, %v1074_v0  ;;  %s1022_s25 = smov 22   ;;  %s1023_s27 = smov 24   ;;  %vm674_vm7 = vcmask 15360   ;;  %vm677_vm8 = vcmask 48128   ;;  %vm679_vm9 = vcmask 64512   ;;  %vm681_vm10 = vcmask 80896  }
  0x1b   : >> { %v482_v46 = vunpack.c.0.s8 %v481_v41  ;;  %v514_v47 = vunpack.c.0.s8 %v513_v43  ;;  %s1024_s28 = smov 26   ;;  %s1025_s30 = smov 28   ;;  %vm683_vm11 = vcmask 97280   ;;  %vm685_vm12 = vcmask 113664  }
  0x1c   : >> { %s1026_s5 = smov 30   ;;  %vm687_vm13 = vcmask 130048   ;;  %s908_s8 = sshll.u32 %s1005_s7, 1  ;;  %vm689_vm14 = vcmask 146432   ;;  %vm691_vm15 = vcmask 162816   ;;  %vm693_vm1 = vcmask 179200  }
  0x1d   : >> { %v485_v48 = vsub.s32 %v482_v46, %v1113_v15  ;;  %v1129_v59 = vsub.s32 %v514_v47, %v1113_v15  ;;  %vm695_vm2 = vcmask 195584   ;;  %vm697_vm4 = vcmask 211968   ;;  %s280_s7 = sadd.s32 1, %s1005_s7  }
  0x1e   : >> { %p277_p5 = scmp.ge.s32.totalorder %s280_s7, 16  }
  0x94   : >> { %v289_v16 = vpop.permute.xlu0 %288 }
  0xed   : >> { %v377_v19 = vpop.f32.mrb[0].mxu0 }
  0xee   : >> { %v378_v20 = vadd.f32 %v377_v19, %v289_v16  ;;  %v920_v21 = vpop.f32.mrb[1].mxu0 }
  0xf0   : >> { %v395_v22 = vrot.slane %v378_v20, %v394_v17  ;;  %v384_v23 = vrot.slane %v378_v20, %v383_v18  ;;  %v406_v26 = vrot.slane %v378_v20, %v405_v24  ;;  %v417_v27 = vrot.slane %v378_v20, %v416_v25 }
  0xf1   : >> { %v428_v30 = vrot.slane %v378_v20, %v427_v28  ;;  %v439_v31 = vrot.slane %v378_v20, %v438_v29  ;;  %v450_v34 = vrot.slane %v378_v20, %v449_v32  ;;  %v461_v35 = vrot.slane %v378_v20, %v460_v33 }
  0xf2   : >> { %397 = vbcast.lane.b32.xlu1 %v395_v22, 256  ;;  %386 = vbcast.lane.b32.xlu0 %v384_v23, 256 }
  0xf6   : >> { %408 = vbcast.lane.b32.xlu1 %v406_v26, 256  ;;  %419 = vbcast.lane.b32.xlu0 %v417_v27, 256 }
  0xfa   : >> { %430 = vbcast.lane.b32.xlu1 %v428_v30, 256  ;;  %441 = vbcast.lane.b32.xlu0 %v439_v31, 256 }
  0xfe   : >> { %452 = vbcast.lane.b32.xlu1 %v450_v34, 256  ;;  %463 = vbcast.lane.b32.xlu0 %v461_v35, 256 }
 0x102   : >> { %390 = vbcast.lane.b32.xlu1 %v384_v23, 264  ;;  %401 = vbcast.lane.b32.xlu0 %v395_v22, 264 }
 0x106   : >> { %412 = vbcast.lane.b32.xlu1 %v406_v26, 264  ;;  %423 = vbcast.lane.b32.xlu0 %v417_v27, 264 }
 0x10a   : >> { %434 = vbcast.lane.b32.xlu1 %v428_v30, 264  ;;  %445 = vbcast.lane.b32.xlu0 %v439_v31, 264 }
 0x10e   : >> { %456 = vbcast.lane.b32.xlu1 %v450_v34, 264  ;;  %467 = vbcast.lane.b32.xlu0 %v461_v35, 264 }
 0x164   : >> { %v398_v36 = vpop.permute.xlu1 %397  ;;  %v387_v37 = vpop.permute.xlu0 %386 }
 0x168   : >> { %v409_v38 = vpop.permute.xlu1 %408  ;;  %v420_v39 = vpop.permute.xlu0 %419 }
 0x16c   : >> { %v431_v44 = vpop.permute.xlu1 %430  ;;  %v442_v45 = vpop.permute.xlu0 %441 }
 0x16d   : >> { %v470_v51 = vsel %vm469_vm6, %v387_v37, %v431_v44  ;;  %v472_v52 = vsel %vm469_vm6, %v398_v36, %v442_v45 }
 0x170   : >> { %v453_v49 = vpop.permute.xlu1 %452  ;;  %v464_v50 = vpop.permute.xlu0 %463 }
 0x171   : >> { %v474_v53 = vsel %vm469_vm6, %v409_v38, %v453_v49  ;;  %v476_v54 = vsel %vm469_vm6, %v420_v39, %v464_v50 }
 0x172   : >> { %v478_v55 = vcombine.low %v470_v51, %v474_v53  ;;  %v479_v56 = vcombine.high %v470_v51, %v474_v53  ;;  %v494_v57 = vcombine.low %v472_v52, %v476_v54  ;;  %v495_v58 = vcombine.high %v472_v52, %v476_v54 }
 0x174   : >> { %v486_v60 = vrot.slane %v478_v55, %v485_v48  ;;  %v493_v61 = vrot.slane %v479_v56, %v485_v48  ;;  %v502_v62 = vrot.slane %v494_v57, %v485_v48  ;;  %v509_v63 = vrot.slane %v495_v58, %v485_v48  ;;  %v391_v3 = vpop.permute.xlu1 %390  ;;  %v402_v4 = vpop.permute.xlu0 %401 }
 0x176   : >> { %v510_v5 = vcombine.low %v486_v60, %v502_v62  ;;  %v511_v6 = vcombine.high %v486_v60, %v502_v62  ;;  %v526_v11 = vcombine.low %v493_v61, %v509_v63  ;;  %v527_v17 = vcombine.high %v493_v61, %v509_v63 }
 0x178   : >> { %v413_v7 = vpop.permute.xlu1 %412  ;;  %v424_v8 = vpop.permute.xlu0 %423  ;;  %v525_v9 = vrot.slane %v511_v6, %v1129_v59  ;;  %v1133_v10 = vrot.slane %v510_v5, %v1129_v59  ;;  %v534_v16 = vrot.slane %v526_v11, %v1129_v59  ;;  %v541_v21 = vrot.slane %v527_v17, %v1129_v59 }
 0x17a   : >> { %619 = vrot.lane.b32.xlu0 %v525_v9, %s1012_s11  ;;  %v542_v12 = vcombine.high %v1133_v10, %v1007_v2  ;;  %v543_v18 = vcombine.high %v525_v9, %v1007_v2  ;;  %v544_v22 = vcombine.high %v534_v16, %v1007_v2  ;;  %v545_v33 = vcombine.high %v541_v21, %v1007_v2  ;;  %s704_s11 = scalar_lea.vmem %s261_s29, %s908_s8 }
 0x17b   : >> { %v714_v9 = vld [vmem:[%s704_s11 + $0x21] sm:$0x1] }
 0x17c   : >> { %v435_v13 = vpop.permute.xlu1 %434  ;;  %615 = vrot.lane.b32.xlu1 %v542_v12, %s1013_s12  ;;  %v446_v14 = vpop.permute.xlu0 %445 }
 0x17d   : >> { %v471_v23 = vsel %vm469_vm6, %v391_v3, %v435_v13  ;;  %v473_v24 = vsel %vm469_vm6, %v402_v4, %v446_v14 }
 0x17e   : >> { %627 = vrot.lane.b32.xlu0 %v534_v16, %s1014_s13 }
 0x180   : >> { %v457_v19 = vpop.permute.xlu1 %456  ;;  %623 = vrot.lane.b32.xlu1 %v543_v18, %s1015_s14  ;;  %v468_v20 = vpop.permute.xlu0 %467  ;;  %v718_v18 = vrot.slane %v714_v9, 5  ;;  %s747_s14 = scalar_lea.vmem %s271_s6, %s908_s8 }
 0x181   : >> { %v475_v25 = vsel %vm469_vm6, %v413_v7, %v457_v19  ;;  %v477_v26 = vsel %vm469_vm6, %v424_v8, %v468_v20  ;;  %v706_v7 = vld [vmem:[%s704_s11 + $0x20] sm:$0x1]  ;;  %v713_v8 = vld [vmem:[%s704_s11 + $0x1] sm:$0x1]  ;;  %vm701_vm6 = vcmask 244736  }
 0x182   : >> { %v546_v27 = vcombine.low %v471_v23, %v475_v25  ;;  %v547_v28 = vcombine.high %v471_v23, %v475_v25  ;;  %v562_v29 = vcombine.low %v473_v24, %v477_v26  ;;  %v563_v30 = vcombine.high %v473_v24, %v477_v26  ;;  %635 = vrot.lane.b32.xlu0 %v541_v21, %s1016_s15  ;;  %v705_v20 = vld [vmem:[%s704_s11] sm:$0x1] }
 0x183   : >> { %v709_v16 = vrot.slane %v706_v7, 7  ;;  %v717_v17 = vrot.slane %v713_v8, 6 }
 0x184   : >> { %v554_v31 = vrot.slane %v546_v27, %v485_v48  ;;  %v570_v32 = vrot.slane %v562_v29, %v485_v48  ;;  %631 = vrot.lane.b32.xlu1 %v544_v22, %s1017_s19  ;;  %v561_v34 = vrot.slane %v547_v28, %v485_v48  ;;  %v577_v35 = vrot.slane %v563_v30, %v485_v48 }
 0x185   : >> { %v710_v25 = vsel %vm296_vm0, %v709_v16, %v705_v20  ;;  %v719_v26 = vsel %vm302_vm3, %v718_v18, %v717_v17 }
 0x186   : >> { %v578_v36 = vcombine.low %v554_v31, %v570_v32  ;;  %v579_v37 = vcombine.high %v554_v31, %v570_v32  ;;  %v594_v41 = vcombine.low %v561_v34, %v577_v35  ;;  %v595_v44 = vcombine.high %v561_v34, %v577_v35 }
 0x188   : >> { %639 = vrot.lane.b32.xlu1 %v545_v33, %s1018_s20  ;;  %v586_v38 = vrot.slane %v578_v36, %v1129_v59  ;;  %v593_v40 = vrot.slane %v579_v37, %v1129_v59  ;;  %v602_v43 = vrot.slane %v594_v41, %v1129_v59  ;;  %v609_v46 = vrot.slane %v595_v44, %v1129_v59 }
 0x18a   : >> { %643 = vrot.lane.b32.xlu0 %v586_v38, %s1019_s21  ;;  %v610_v39 = vcombine.high %v586_v38, %v1007_v2  ;;  %v611_v42 = vcombine.high %v593_v40, %v1007_v2  ;;  %v612_v45 = vcombine.high %v602_v43, %v1007_v2  ;;  %v613_v47 = vcombine.high %v609_v46, %v1007_v2 }
 0x18c   : >> { %647 = vrot.lane.b32.xlu1 %v610_v39, %s1020_s22 }
 0x18e   : >> { %651 = vrot.lane.b32.xlu0 %v593_v40, %s1021_s24 }
 0x190   : >> { %655 = vrot.lane.b32.xlu1 %v611_v42, %s1022_s25 }
 0x192   : >> { %659 = vrot.lane.b32.xlu0 %v602_v43, %s1023_s27 }
 0x194   : >> { %663 = vrot.lane.b32.xlu1 %v612_v45, %s1024_s28 }
 0x196   : >> { %667 = vrot.lane.b32.xlu0 %v609_v46, %s1025_s30 }
 0x198   : >> { %671 = vrot.lane.b32.xlu1 %v613_v47, %s1026_s5 }
 0x1ec   : >> { %v620_v48 = vpop.permute.xlu0 %619 }
 0x1ee   : >> { %v616_v49 = vpop.permute.xlu1 %615 }
 0x1ef   : >> { %v675_v50 = vsel %vm674_vm7, %v1133_v10, %v616_v49  ;;  %v1027_v10 = vmov 1966171168   ;;  %vm748_vm7 = vcmask 253952  }
 0x1f0   : >> { %v628_v51 = vpop.permute.xlu0 %627  ;;  %v676_v53 = vsel %vm304_vm5, %v675_v50, %v620_v48  ;;  %v724_v11 = vunpack.c.l.s4 %v1027_v10  ;;  %vm699_vm5 = vcmask 228352  }
 0x1f2   : >> { %v624_v52 = vpop.permute.xlu1 %623  ;;  %v725_v21 = vunpack.c.0.s8 %v724_v11 }
 0x1f3   : >> { %v678_v54 = vsel %vm677_vm8, %v676_v53, %v624_v52 }
 0x1f4   : >> { %v680_v2 = vsel %vm679_vm9, %v678_v54, %v628_v51  ;;  %v636_v57 = vpop.permute.xlu0 %635  ;;  %v728_v27 = vsub.s32 %v725_v21, %v1113_v15 }
 0x1f6   : >> { %v632_v55 = vpop.permute.xlu1 %631 }
 0x1f7   : >> { %v682_v56 = vsel %vm681_vm10, %v680_v2, %v632_v55 }
 0x1f8   : >> { %v684_v59 = vsel %vm683_vm11, %v682_v56, %v636_v57 }
 0x1fa   : >> { %v640_v58 = vpop.permute.xlu1 %639 }
 0x1fb   : >> { %v686_v60 = vsel %vm685_vm12, %v684_v59, %v640_v58 }
 0x1fc   : >> { %v644_v61 = vpop.permute.xlu0 %643 }
 0x1fd   : >> { %v688_v62 = vsel %vm687_vm13, %v686_v60, %v644_v61 }
 0x1fe   : >> { %v648_v63 = vpop.permute.xlu1 %647 }
 0x1ff   : >> { %v690_v3 = vsel %vm689_vm14, %v688_v62, %v648_v63 }
 0x200   : >> { %v652_v4 = vpop.permute.xlu0 %651 }
 0x201   : >> { %v692_v5 = vsel %vm691_vm15, %v690_v3, %v652_v4 }
 0x202   : >> { %v656_v6 = vpop.permute.xlu1 %655 }
 0x203   : >> { %v694_v12 = vsel %vm693_vm1, %v692_v5, %v656_v6 }
 0x204   : >> { %v660_v13 = vpop.permute.xlu0 %659 }
 0x205   : >> { %v696_v14 = vsel %vm695_vm2, %v694_v12, %v660_v13 }
 0x206   : >> { %v664_v19 = vpop.permute.xlu1 %663 }
 0x207   : >> { %v698_v22 = vsel %vm697_vm4, %v696_v14, %v664_v19 }
 0x208   : >> { %v668_v23 = vpop.permute.xlu0 %667 }
 0x209   : >> { %v700_v24 = vsel %vm699_vm5, %v698_v22, %v668_v23 }
 0x20a   : >> { %v672_v28 = vpop.permute.xlu1 %671 }
 0x20b   : >> { %v702_v29 = vsel %vm701_vm6, %v700_v24, %v672_v28 }
 0x20c   : >> { %v712_v30 = vadd.f32 %v710_v25, %v702_v29  ;;  %v721_v31 = vadd.f32 %v719_v26, %v702_v29 }
 0x20e   : >> { %v729_v32 = vrot.slane %v712_v30, %v728_v27  ;;  %v758_v33 = vrot.slane %v721_v31, %v728_v27 }
 0x210   : >> { %v730_v34 = vcombine.high %v729_v32, %v729_v32  ;;  %v737_v35 = vrot.slane %v729_v32, %v728_v27  ;;  %v759_v36 = vcombine.high %v758_v33, %v758_v33  ;;  %v766_v37 = vrot.slane %v758_v33, %v728_v27  ;;  %279 = sbr.rel (!%p277_p5) target bundleno = 18 (0x12), region = 79 }
 0x212   : >> { %v744_v38 = vrot.slane %v730_v34, %v728_v27  ;;  %749 = vst.msk [vmem:[%s747_s14] sm:$0x1] %vm748_vm7, %v737_v35  ;;  %v773_v15 = vrot.slane %v759_v36, %v728_v27  ;;  %v774_v39 = vcombine.high %v766_v37, %v766_v37 }
 0x214   : >> { %750 = vst.msk [vmem:[%s747_s14 + $0x20] sm:$0x1] %vm748_vm7, %v744_v38  ;;  %v775_v40 = vcombine.high %v773_v15, %v773_v15  ;;  %778 = vst.msk [vmem:[%s747_s14 + $0x1] sm:$0x1] %vm748_vm7, %v774_v39 }
 0x216   : >> { %779 = vst.msk [vmem:[%s747_s14 + $0x21] sm:$0x1] %vm748_vm7, %v775_v40 }
 0x217 PF: > { %s14_s17 = sadd.s32 1, %s1001_s17   ;;  %s1191_s15 = smov %s997_s16 }
 0x218   : > { %p11_p6 = scmp.ge.s32.totalorder %s14_s17, 4   ;;  %s1192_s16 = smov %s1194_s18 }
 0x21a   :  { %13 = sbr.rel (!%p11_p6) target bundleno = 2 (0x2), region = 90 }

</bundles_post_ra>
